<compile_context>
chip_gen: v5e
topology: v5e:2x2
jax: 0.10.0
libtpu: 0.0.40
codegen_flags: <defaults>
</compile_context>

<pallas_src>
import jax
import jax.numpy as jnp
from jax.experimental import pallas as pl
from jax.experimental.pallas import tpu as pltpu


def _round_up(n, m):
    return ((n + m - 1) // m) * m


def _choose_tile_b(B, tile_b, sublane):
    # Aim for >= 8 grid steps (>= 4 per TensorCore on v7x) so the pipelined /
    # "parallel" batch axis has enough work to overlap and balance, but never
    # a bigger tile than tile_b or than the (sublane-rounded) batch itself.
    tb = max(sublane, -(-B // 8))
    tb = min(tb, tile_b, _round_up(B, sublane))
    if tb >= 256:
        tb = _round_up(tb, 256)     # fill the 256-row MXU on v6e/v7x
    else:
        tb = _round_up(tb, sublane)
    return tb


def nonlinearf_kernel(x_ref, w1_ref, b1_ref, w2_ref, b2_ref, o_ref):
    # First Linear on the MXU. Operands stay in their input dtype (bf16 fast
    # path when params were prepared as bf16); accumulate in f32.
    h = jnp.dot(x_ref[...], w1_ref[...], preferred_element_type=jnp.float32)
    h = h + b1_ref[...].astype(jnp.float32)
    # Sigmoid in f32 on the EUP (v5e has no bf16 VPU/EUP).
    h = jax.nn.sigmoid(h)
    # Second Linear; cast activations back to the weight dtype for the MXU.
    y = jnp.dot(h.astype(w2_ref.dtype), w2_ref[...],
                preferred_element_type=jnp.float32)
    y = y + b2_ref[...].astype(jnp.float32)
    o_ref[...] = y.astype(o_ref.dtype)


def prepare_params(w1, b1, w2, b2, dtype=None):
    """One-time parameter prep (hoist out of the per-step path).

    Reshapes biases to (1, n) and optionally casts everything to a compute
    dtype (e.g. jnp.bfloat16 for the MXU fast path / halved VMEM residency).
    """
    b1 = jnp.reshape(b1, (1, -1))
    b2 = jnp.reshape(b2, (1, -1))
    if dtype is not None:
        w1, b1, w2, b2 = (a.astype(dtype) for a in (w1, b1, w2, b2))
    return w1, b1, w2, b2


def nonlinearf_forward(x, w1, b1, w2, b2, *, tile_b=1024):
    """x: (B, in_dim); w1: (in_dim, hidden); b1: (hidden,)/(1, hidden);
       w2: (hidden, out_dim); b2: (out_dim,)/(1, out_dim) -> (B, out_dim)."""
    B, in_dim = x.shape
    hidden = w1.shape[1]
    out_dim = w2.shape[1]
    b1 = jnp.reshape(b1, (1, hidden))
    b2 = jnp.reshape(b2, (1, out_dim))

    sublane = 16 if jnp.dtype(x.dtype) == jnp.dtype(jnp.bfloat16) else 8
    tb = _choose_tile_b(B, tile_b, sublane)
    grid = (pl.cdiv(B, tb),)   # ragged last tile: Pallas masks its writeback

    # --- VMEM budget computed from the actual footprint (not hard-coded).
    xb = jnp.dtype(x.dtype).itemsize
    wb = jnp.dtype(w1.dtype).itemsize
    weight_bytes = (in_dim * hidden + hidden + hidden * out_dim + out_dim) * wb
    io_bytes = tb * (in_dim + out_dim) * xb          # streamed x/out tiles
    interm_bytes = tb * (hidden + out_dim) * 4       # f32 intermediates
    footprint = 2 * (weight_bytes + io_bytes) + interm_bytes   # 2x: double-buffer
    vmem_limit = int(min(max(4 * footprint + (4 << 20), 16 << 20), 48 << 20))

    const = lambda i: (0, 0)   # weights/biases: same block every step -> resident

    return pl.pallas_call(
        nonlinearf_kernel,
        out_shape=jax.ShapeDtypeStruct((B, out_dim), x.dtype),
        grid_spec=pltpu.PrefetchScalarGridSpec(
            num_scalar_prefetch=0,
            grid=grid,
            in_specs=[
                pl.BlockSpec((tb, in_dim), lambda i: (i, 0)),  # x tile (pipelined)
                pl.BlockSpec((in_dim, hidden), const),         # W1 (resident)
                pl.BlockSpec((1, hidden), const),              # b1 (resident)
                pl.BlockSpec((hidden, out_dim), const),        # W2 (resident)
                pl.BlockSpec((1, out_dim), const),             # b2 (resident)
            ],
            out_specs=pl.BlockSpec((tb, out_dim), lambda i: (i, 0)),
        ),
        compiler_params=pltpu.CompilerParams(
            dimension_semantics=("parallel",),
            vmem_limit_bytes=vmem_limit,
        ),
    )(x, w1, b1, w2, b2)


def init_params(key, in_dim, hidden, out_dim, baseinit=False, dtype=jnp.float32):
    """baseinit=True matches nn.init.constant_(weight, 1), bias=0.
    Otherwise mimics PyTorch's default U(-1/sqrt(fan_in), 1/sqrt(fan_in))."""
    if baseinit:
        return (jnp.ones((in_dim, hidden), dtype), jnp.zeros((1, hidden), dtype),
                jnp.ones((hidden, out_dim), dtype), jnp.zeros((1, out_dim), dtype))
    k1, k2, k3, k4 = jax.random.split(key, 4)
    bound1 = 1.0 / (in_dim ** 0.5)
    bound2 = 1.0 / (hidden ** 0.5)
    w1 = jax.random.uniform(k1, (in_dim, hidden), dtype, -bound1, bound1)
    b1 = jax.random.uniform(k2, (1, hidden), dtype, -bound1, bound1)
    w2 = jax.random.uniform(k3, (hidden, out_dim), dtype, -bound2, bound2)
    b2 = jax.random.uniform(k4, (1, out_dim), dtype, -bound2, bound2)
    return w1, b1, w2, b2


if __name__ == "__main__":
    # Module defaults: hidden=5, out_dim=1; small in_dim / batch.
    B, in_dim, hidden, out_dim = 8, 4, 5, 1

    key = jax.random.PRNGKey(0)
    kx, kp = jax.random.split(key)
    x = jax.random.normal(kx, (B, in_dim), jnp.float32)

    # Default (PyTorch-style) init; params prepared once outside the call path.
    w1, b1, w2, b2 = prepare_params(*init_params(kp, in_dim, hidden, out_dim))
    out = jax.block_until_ready(nonlinearf_forward(x, w1, b1, w2, b2))
    ref = jax.nn.sigmoid(x @ w1 + b1) @ w2 + b2
    assert out.shape == (B, out_dim)
    assert jnp.allclose(out, ref, atol=1e-5, rtol=1e-5)

    # baseinit=True path (weight=1, bias=0)
    w1b, b1b, w2b, b2b = prepare_params(
        *init_params(kp, in_dim, hidden, out_dim, baseinit=True))
    out_b = jax.block_until_ready(nonlinearf_forward(x, w1b, b1b, w2b, b2b))
    ref_b = jax.nn.sigmoid(x @ w1b + b1b) @ w2b + b2b
    assert jnp.allclose(out_b, ref_b, atol=1e-5, rtol=1e-5)

    # Larger, ragged batch: exercises the multi-step cdiv grid and the masked
    # writeback of the ragged last tile (no HBM padding anywhere).
    B2 = 1000
    x2 = jax.random.normal(kx, (B2, in_dim), jnp.float32)
    out2 = jax.block_until_ready(nonlinearf_forward(x2, w1, b1, w2, b2))
    ref2 = jax.nn.sigmoid(x2 @ w1 + b1) @ w2 + b2
    assert out2.shape == (B2, out_dim)
    assert jnp.allclose(out2, ref2, atol=1e-5, rtol=1e-5)

    print("KERNEL_OK")
</pallas_src>

<mosaic_0001>
module attributes {stable_mosaic.version = 11 : i64} {
  func.func @nonlinearf_kernel(%arg0: i32, %arg1: memref<8x4xf32, #tpu.memory_space<vmem>>, %arg2: memref<4x5xf32, #tpu.memory_space<vmem>>, %arg3: memref<1x5xf32, #tpu.memory_space<vmem>>, %arg4: memref<5x1xf32, #tpu.memory_space<vmem>>, %arg5: memref<1x1xf32, #tpu.memory_space<vmem>>, %arg6: memref<8x1xf32, #tpu.memory_space<vmem>>) attributes {dimension_semantics = [#tpu.dimension_semantics<parallel>], iteration_bounds = array<i64: 1>, scalar_prefetch = 0 : i64, scratch_operands = 0 : i64, tpu.core_type = #tpu.core_type<tc>, window_params = [{transform_indices = @transform_0, window_bounds = array<i64: 8, 4>}, {pipeline_mode = #tpu.pipeline_mode<synchronous>, transform_indices = @transform_1, window_bounds = array<i64: 4, 5>}, {pipeline_mode = #tpu.pipeline_mode<synchronous>, transform_indices = @transform_2, window_bounds = array<i64: 1, 5>}, {pipeline_mode = #tpu.pipeline_mode<synchronous>, transform_indices = @transform_3, window_bounds = array<i64: 5, 1>}, {pipeline_mode = #tpu.pipeline_mode<synchronous>, transform_indices = @transform_4, window_bounds = array<i64: 1, 1>}, {transform_indices = @transform_5, window_bounds = array<i64: 8, 1>}]} {
    %c0 = arith.constant 0 : index
    %c0_0 = arith.constant 0 : index
    %0 = vector.load %arg1[%c0, %c0_0] : memref<8x4xf32, #tpu.memory_space<vmem>>, vector<8x4xf32>
    %c0_1 = arith.constant 0 : index
    %c0_2 = arith.constant 0 : index
    %1 = vector.load %arg2[%c0_1, %c0_2] : memref<4x5xf32, #tpu.memory_space<vmem>>, vector<4x5xf32>
    %cst = arith.constant dense<0.000000e+00> : vector<8x5xf32>
    %2 = tpu.matmul %0, %1, %cst {dimension_numbers = #tpu.dot_dimension_numbers<[1], [0], [0], [1], [0, 0, 1, 1], [], []>} : vector<8x4xf32>, vector<4x5xf32>, vector<8x5xf32> -> vector<8x5xf32>
    %c0_3 = arith.constant 0 : index
    %c0_4 = arith.constant 0 : index
    %3 = vector.load %arg3[%c0_3, %c0_4] : memref<1x5xf32, #tpu.memory_space<vmem>>, vector<1x5xf32>
    %4 = vector.broadcast %3 : vector<1x5xf32> to vector<8x5xf32>
    %5 = arith.addf %2, %4 : vector<8x5xf32>
    %6 = arith.negf %5 : vector<8x5xf32>
    %7 = math.exp %6 : vector<8x5xf32>
    %cst_5 = arith.constant 1.000000e+00 : f32
    %8 = vector.broadcast %cst_5 : f32 to vector<8x5xf32>
    %9 = arith.addf %8, %7 : vector<8x5xf32>
    %10 = arith.divf %8, %9 : vector<8x5xf32>
    %c0_6 = arith.constant 0 : index
    %c0_7 = arith.constant 0 : index
    %11 = vector.load %arg4[%c0_6, %c0_7] : memref<5x1xf32, #tpu.memory_space<vmem>>, vector<5x1xf32>
    %cst_8 = arith.constant dense<0.000000e+00> : vector<8x1xf32>
    %12 = tpu.matmul %10, %11, %cst_8 {dimension_numbers = #tpu.dot_dimension_numbers<[1], [0], [0], [1], [0, 0, 1, 1], [], []>} : vector<8x5xf32>, vector<5x1xf32>, vector<8x1xf32> -> vector<8x1xf32>
    %c0_9 = arith.constant 0 : index
    %c0_10 = arith.constant 0 : index
    %13 = vector.load %arg5[%c0_9, %c0_10] : memref<1x1xf32, #tpu.memory_space<vmem>>, vector<1x1xf32>
    %14 = vector.broadcast %13 : vector<1x1xf32> to vector<8x1xf32>
    %15 = arith.addf %12, %14 : vector<8x1xf32>
    %c0_11 = arith.constant 0 : index
    %c0_12 = arith.constant 0 : index
    %16 = vector.load %arg6[%c0_11, %c0_12] : memref<8x1xf32, #tpu.memory_space<vmem>>, vector<8x1xf32>
    tpu.vector_store %arg6[%c0_11, %c0_12], %15 {strides = array<i32>} : memref<8x1xf32, #tpu.memory_space<vmem>>, vector<8x1xf32>,
    return
  }
  func.func @transform_0(%arg0: i32) -> (i32, i32) {
    %c0_i32 = arith.constant 0 : i32
    %c0_i32_0 = arith.constant 0 : i32
    return %arg0, %c0_i32 : i32, i32
  }
  func.func @transform_1(%arg0: i32) -> (i32, i32) {
    %c0_i32 = arith.constant 0 : i32
    %c0_i32_0 = arith.constant 0 : i32
    %c0_i32_1 = arith.constant 0 : i32
    return %c0_i32, %c0_i32_0 : i32, i32
  }
  func.func @transform_2(%arg0: i32) -> (i32, i32) {
    %c0_i32 = arith.constant 0 : i32
    %c0_i32_0 = arith.constant 0 : i32
    %c0_i32_1 = arith.constant 0 : i32
    return %c0_i32, %c0_i32_0 : i32, i32
  }
  func.func @transform_3(%arg0: i32) -> (i32, i32) {
    %c0_i32 = arith.constant 0 : i32
    %c0_i32_0 = arith.constant 0 : i32
    %c0_i32_1 = arith.constant 0 : i32
    return %c0_i32, %c0_i32_0 : i32, i32
  }
  func.func @transform_4(%arg0: i32) -> (i32, i32) {
    %c0_i32 = arith.constant 0 : i32
    %c0_i32_0 = arith.constant 0 : i32
    %c0_i32_1 = arith.constant 0 : i32
    return %c0_i32, %c0_i32_0 : i32, i32
  }
  func.func @transform_5(%arg0: i32) -> (i32, i32) {
    %c0_i32 = arith.constant 0 : i32
    %c0_i32_0 = arith.constant 0 : i32
    return %arg0, %c0_i32 : i32, i32
  }
}

</mosaic_0001>

<bundles_post_ra>
// kernel: tpu_custom_call.1
= control target key start
LH: loop header
LB: loop body
LE: loop exit
PB: predicated region body
PF: predicated region fallthrough
CT: control target
= control target key end

     0   :  { %vm32_vm0 = vcmask 1043456   ;;  %vm28_vm1 = vcmask 31744   ;;  %vm84_vm2 = vcmask 1044480   ;;  %vm80_vm6 = vcmask 39936   ;;  %s173_s1 = inlined_call_operand.vmem [shape: f32[4,5], index: 1, kind: input, shape index: {}]   ;;  %s174_s0 = inlined_call_operand.vmem [shape: f32[8,4], index: 0, kind: input, shape index: {}]   ;;  %s175_s2 = inlined_call_operand.vmem [shape: f32[1,5], index: 2, kind: input, shape index: {}]   ;;  %s176_s3 = inlined_call_operand.vmem [shape: f32[5,1], index: 3, kind: input, shape index: {}]   ;;  %s177_s4 = inlined_call_operand.<no memory space> [shape: f32[1,1], index: 4, kind: input, shape index: {}]   ;;  %s178_s5 = inlined_call_operand.vmem [shape: f32[8,1], index: 5, kind: output, shape index: {}]  }
   0x1   :  { %v23_v0 = vld [vmem:[%s173_s1] sm:$0xf]  ;;  %v10_v4 = vstv %s177_s4  ;;  %vm108_vm8 = vcmask 7168  }
   0x2   :  { %v22_v1 = vld [vmem:[%s174_s0] sm:$0xff]  ;;  %114 = vmatpush.msk.msra.mxu0 %vm32_vm0, %v23_v0  ;;  %11 = vst [vmem:[#allocation2] sm:$0x1] %v10_v4 }
   0x3   :  { %115 = vmatmul.msk.f32.vlgmr.msra.gmra.mxu0 %vm28_vm1, %v22_v1  ;;  %v75_v2 = vld [vmem:[%s176_s3] sm:$0x1f] }
   0x4   :  { %117 = vmatpush.msk.msra.mxu1 %vm84_vm2, %v75_v2  ;;  %v119_v3 = vld [vmem:[%s175_s2] ss:$0 sm:$0xff] }
   0x9   :  { %v120_v20 = vld [vmem:[#allocation2] ss:$0 sm:$0xff] }
  0x80   :  { %v53_v5 = vpop.f32.mrf.mxu0 }
  0x81   :  { %v54_v6 = vadd.f32 %v119_v3, %v53_v5 }
  0x83   :  { %v116_v7 = vmul.f32 -1.442695, %v54_v6 }
  0x85   :  { %121 = vpow2.f32 %v116_v7 }
  0x8b   :  { %v122_v8 = vpop.eup %121 }
  0x8c   :  { %v59_v9 = vadd.f32 1.0, %v122_v8 }
  0x8e   :  { %123 = vrcp.f32 %v59_v9  ;;  %v71_v13 = vand.u32 2147483648, %v59_v9  ;;  %v69_v15 = vand.u32 2147483647, %v59_v9  ;;  %vm65_vm4 = vweird.f32 %v59_v9 }
  0x90   :  { %v72_v17 = vor.u32 1.1754944e-38, %v71_v13  ;;  %vm70_vm7 = vcmp.eq.f32.partialorder %v69_v15, 8.507059e+37 }
  0x94   :  { %v124_v10 = vpop.eup %123 }
  0x95   :  { %v61_v11 = vmul.f32 %v124_v10, %v59_v9  ;;  %vm66_vm3 = vweird.f32 %v124_v10 }
  0x96   :  { %vm67_vm5 = vmor %vm65_vm4, %vm66_vm3 }
  0x97   :  { %v62_v12 = vsub.f32 1.0, %v61_v11 }
  0x99   :  { %v63_v14 = vmul.f32 %v124_v10, %v62_v12 }
  0x9b   :  { %v64_v16 = vadd.f32 %v124_v10, %v63_v14 }
  0x9d   :  { %v68_v18 = vsel %vm67_vm5, %v124_v10, %v64_v16 }
  0x9e   :  { %v73_v19 = vsel %vm70_vm7, %v72_v17, %v68_v18 }
  0x9f   :  { %118 = vmatmul.msk.f32.vlgmr.msra.gmra.mxu1 %vm80_vm6, %v73_v19 }
 0x11c   :  { %v105_v21 = vpop.f32.mrf.mxu1 }
 0x11d   :  { %v106_v22 = vadd.f32 %v120_v20, %v105_v21 }
 0x11f   :  { %109 = vst.msk [vmem:[%s178_s5] sm:$0xff] %vm108_vm8, %v106_v22 }

</bundles_post_ra>
